<compile_context>
chip_gen: v7x
topology: tpu7x:2x2x1
jax: 0.10.0
libtpu: 0.0.40
codegen_flags: <defaults>
</compile_context>

<pallas_src>
import functools
import math

import jax
import jax.numpy as jnp
from jax.experimental import pallas as pl
from jax.experimental.pallas import tpu as pltpu


# ----------------------------- model config ---------------------------------
DIM = 64
N_HEADS = 4
N_KV_HEADS = 2
HEAD_DIM = DIM // N_HEADS            # 16
N_REP = N_HEADS // N_KV_HEADS        # 2
MULTIPLE_OF = 32
NORM_EPS = 1e-5
MAX_BATCH = 4
MAX_SEQ_LEN = 16
BATCH = 2
SEQLEN = 8
START_POS = 0                        # prefill from position 0 (cache is zeros)

_hidden = int(2 * (4 * DIM) / 3)
FFN_HIDDEN = MULTIPLE_OF * ((_hidden + MULTIPLE_OF - 1) // MULTIPLE_OF)   # 192

Q_W = N_HEADS * HEAD_DIM             # 64   (query lanes in fused projection)
KV_W = N_KV_HEADS * HEAD_DIM         # 32   (key / value lanes)
QKV_W = Q_W + 2 * KV_W               # 128  (lane-dense fused qkv width)

# MXU operand dtype (accumulation is always f32).  bf16 is MXU-native on
# v5e/v6e/v7x; elementwise math stays f32 so the VPU/EUP path is fine on v5e.
MM_DTYPE = jnp.bfloat16
TOL = 2e-2 if MM_DTYPE == jnp.bfloat16 else 2e-4


# --------------------------- weight preparation ------------------------------
def _pair_swap_cols(w):
    """Swap adjacent output columns (2i <-> 2i+1): folds the RoPE pair-swap
    into the projection weight so no in-kernel lane interleave is needed."""
    k, n = w.shape
    return w.reshape(k, n // 2, 2)[:, :, ::-1].reshape(k, n)


def prepare_params(p):
    """One-time packing: pre-transposed, concatenated, bf16 matmul weights."""
    wqkv = jnp.concatenate([p["wq"].T, p["wk"].T, p["wv"].T], axis=1)   # (D, 128)
    wqkv_ext = jnp.concatenate([wqkv, _pair_swap_cols(wqkv)], axis=1)   # (D, 256)
    return {
        "wqkv_ext": wqkv_ext.astype(MM_DTYPE),                            # (D, 256)
        "wo_t": p["wo"].T.astype(MM_DTYPE),                               # (Q_W, D)
        "w13": jnp.concatenate([p["w1"].T, p["w3"].T], axis=1).astype(MM_DTYPE),  # (D, 384)
        "w2_t": p["w2"].T.astype(MM_DTYPE),                               # (FFN, D)
        "attn_norm_w": p["attn_norm_w"].reshape(1, DIM),                  # f32
        "ffn_norm_w": p["ffn_norm_w"].reshape(1, DIM),                    # f32
    }


def _rope_tables(cos, sin):
    """Expand (S, Dh/2) cos/sin into (S, QKV_W) tables matching the fused
    [q | k | v] projection lanes (v lanes: cos=1, sin=0 -> identity)."""
    s, d2 = cos.shape
    cos2 = jnp.repeat(cos, 2, axis=-1)                         # [c0,c0,c1,c1,...]
    sin2 = jnp.repeat(sin, 2, axis=-1)
    sign = jnp.tile(jnp.array([-1.0, 1.0], dtype=cos.dtype), d2)
    sin2 = sin2 * sign                                         # -s on even, +s on odd
    n_qk = N_HEADS + N_KV_HEADS
    cos_tab = jnp.concatenate(
        [jnp.tile(cos2, (1, n_qk)), jnp.ones((s, KV_W), cos.dtype)], axis=1)
    sin_tab = jnp.concatenate(
        [jnp.tile(sin2, (1, n_qk)), jnp.zeros((s, KV_W), cos.dtype)], axis=1)
    return cos_tab, sin_tab


# ------------------------------ fused kernel ---------------------------------
def _block_kernel(bb, seqlen, start_pos, scale,
                  x_ref, anw_ref, fnw_ref, wqkv_ref, wo_ref, w13_ref, w2_ref,
                  cos_ref, sin_ref, mask_ref, ck_in_ref, cv_in_ref,
                  o_ref, ck_ref, cv_ref):
    S = seqlen
    x = x_ref[...]                                            # (bb*S, D) f32

    # ---- RMSNorm (attention) ----
    xn = x * jax.lax.rsqrt(jnp.mean(x * x, axis=-1, keepdims=True) + NORM_EPS)
    xn = xn * anw_ref[...]

    # ---- one fused QKV matmul; RoPE pair-swap folded into the weight copy ----
    qkv2 = jnp.dot(xn.astype(MM_DTYPE), wqkv_ref[...],
                   preferred_element_type=jnp.float32)        # (bb*S, 2*QKV_W)
    # out = qkv * cos + pair_swapped(qkv) * (+-sin); v lanes are identity.
    qkv = qkv2[:, :QKV_W] * cos_ref[...] + qkv2[:, QKV_W:] * sin_ref[...]

    q_mm = qkv[:, :Q_W].astype(MM_DTYPE)                      # (bb*S, 64)
    k_new = qkv[:, Q_W:Q_W + KV_W]                            # (bb*S, 32) f32
    v_new = qkv[:, Q_W + KV_W:QKV_W]                          # (bb*S, 32) f32

    # ---- slice-only KV-cache writeback: the out block IS the written rows ----
    ck_ref[...] = k_new.reshape(bb, S, KV_W).astype(ck_ref.dtype)
    cv_ref[...] = v_new.reshape(bb, S, KV_W).astype(cv_ref.dtype)

    # ---- GQA attention: stack the N_REP query heads that share a KV head so
    #      each KV group costs one QK^T + one softmax + one PV matmul ----
    mask2 = mask_ref[...]                                     # (N_REP*S, L) f32
    o_rows = []
    for b in range(bb):
        r0 = b * S
        if start_pos > 0:
            k_ctx = jnp.concatenate(
                [ck_in_ref[b, :start_pos, :], k_new[r0:r0 + S, :]], axis=0)
            v_ctx = jnp.concatenate(
                [cv_in_ref[b, :start_pos, :], v_new[r0:r0 + S, :]], axis=0)
        else:
            k_ctx = k_new[r0:r0 + S, :]
            v_ctx = v_new[r0:r0 + S, :]
        k_mm = k_ctx.astype(MM_DTYPE)                         # (L, KV_W)
        v_mm = v_ctx.astype(MM_DTYPE)
        head_outs = []
        for g in range(N_KV_HEADS):
            k_g = k_mm[:, g * HEAD_DIM:(g + 1) * HEAD_DIM]    # (L, Dh) shared KV head
            v_g = v_mm[:, g * HEAD_DIM:(g + 1) * HEAD_DIM]
            qh0 = g * N_REP
            q_pair = jnp.concatenate(
                [q_mm[r0:r0 + S, (qh0 + r) * HEAD_DIM:(qh0 + r + 1) * HEAD_DIM]
                 for r in range(N_REP)], axis=0)              # (N_REP*S, Dh)
            # QK^T with no explicit transpose: contract the HEAD_DIM axes.
            s_pair = jax.lax.dot_general(
                q_pair, k_g, (((1,), (1,)), ((), ())),
                preferred_element_type=jnp.float32) * scale + mask2
            p = jnp.exp(s_pair - jnp.max(s_pair, axis=-1, keepdims=True))
            p = p * pl.reciprocal(jnp.sum(p, axis=-1, keepdims=True), approx=True)
            o_pair = jnp.dot(p.astype(MM_DTYPE), v_g,
                             preferred_element_type=jnp.float32)   # (N_REP*S, Dh)
            for r in range(N_REP):
                head_outs.append(o_pair[r * S:(r + 1) * S, :])
        o_rows.append(jnp.concatenate(head_outs, axis=1))     # (S, Q_W)
    o_all = o_rows[0] if bb == 1 else jnp.concatenate(o_rows, axis=0)   # (bb*S, Q_W)

    # ---- ONE Wo matmul over the head-concat tile, + residual ----
    h = x + jnp.dot(o_all.astype(MM_DTYPE), wo_ref[...],
                    preferred_element_type=jnp.float32)

    # ---- RMSNorm (ffn) + SwiGLU with lane-packed w1|w3 weight ----
    hn = h * jax.lax.rsqrt(jnp.mean(h * h, axis=-1, keepdims=True) + NORM_EPS)
    hn = hn * fnw_ref[...]
    ab = jnp.dot(hn.astype(MM_DTYPE), w13_ref[...],
                 preferred_element_type=jnp.float32)          # (bb*S, 2*FFN)
    a = ab[:, :FFN_HIDDEN]
    c = ab[:, FFN_HIDDEN:]
    ff = (a * jax.nn.sigmoid(a)) * c
    o_ref[...] = (h + jnp.dot(ff.astype(MM_DTYPE), w2_ref[...],
                              preferred_element_type=jnp.float32)).astype(o_ref.dtype)


# --------------------------- TransformerBlock fwd ---------------------------
def _single_tensorcore():
    """True on single-TC chips (v5e / v6e); v7x (2 TCs) keeps a per-batch grid."""
    try:
        kind = jax.devices()[0].device_kind.lower()
    except Exception:
        return False
    return any(t in kind for t in ("v5e", "v5 lite", "v6e", "v6 lite", "lite"))


def _transformer_block_impl(prep, x, start_pos, cos, sin, mask, cache_k, cache_v):
    B, S, D = x.shape
    L = start_pos + S
    # TODO(synk): general start_pos (not a multiple of seqlen) needs pl.Element
    # row offsets for the cache write block; the module test uses start_pos=0.
    assert start_pos % S == 0

    x2 = x.reshape(B * S, D)
    ck3 = cache_k.reshape(MAX_BATCH, MAX_SEQ_LEN, KV_W)
    cv3 = cache_v.reshape(MAX_BATCH, MAX_SEQ_LEN, KV_W)

    cos_tab, sin_tab = _rope_tables(cos, sin)                  # (S, QKV_W)
    cos_tab = jnp.tile(cos_tab, (B, 1))                        # (B*S, QKV_W)
    sin_tab = jnp.tile(sin_tab, (B, 1))
    mask2 = jnp.concatenate([mask] * N_REP, axis=0)            # (N_REP*S, L)

    # single-TC chips: one grid step over the whole slab; multi-TC: batch grid.
    bb = B if _single_tensorcore() else 1
    if B % bb:
        bb = 1
    nsteps = B // bb

    pfx_rows = max(8, -(-start_pos // 8) * 8)   # old-cache rows the kernel may read
    start_blk = start_pos // S

    kernel = functools.partial(_block_kernel, bb, S, start_pos,
                               1.0 / math.sqrt(HEAD_DIM))
    const = lambda i: (0, 0)

    out2, ck_new, cv_new = pl.pallas_call(
        kernel,
        grid=(nsteps,),
        in_specs=[
            pl.BlockSpec((bb * S, D), lambda i: (i, 0)),               # x rows
            pl.BlockSpec((1, D), const),                               # attn norm weight
            pl.BlockSpec((1, D), const),                               # ffn norm weight
            pl.BlockSpec((D, 2 * QKV_W), const),                       # fused wqkv (+swapped)
            pl.BlockSpec((Q_W, D), const),                             # wo
            pl.BlockSpec((D, 2 * FFN_HIDDEN), const),                  # w1|w3 lane-packed
            pl.BlockSpec((FFN_HIDDEN, D), const),                      # w2
            pl.BlockSpec((bb * S, QKV_W), lambda i: (i, 0)),           # RoPE cos table
            pl.BlockSpec((bb * S, QKV_W), lambda i: (i, 0)),           # RoPE sin table
            pl.BlockSpec((N_REP * S, L), const),                       # pair-stacked mask
            pl.BlockSpec((bb, pfx_rows, KV_W), lambda i: (i, 0, 0)),   # cache_k prefix
            pl.BlockSpec((bb, pfx_rows, KV_W), lambda i: (i, 0, 0)),   # cache_v prefix
        ],
        out_specs=[
            pl.BlockSpec((bb * S, D), lambda i: (i, 0)),
            pl.BlockSpec((bb, S, KV_W), lambda i: (i, start_blk, 0)),  # slice-only write
            pl.BlockSpec((bb, S, KV_W), lambda i: (i, start_blk, 0)),
        ],
        out_shape=(
            jax.ShapeDtypeStruct((B * S, D), x.dtype),
            jax.ShapeDtypeStruct((MAX_BATCH, MAX_SEQ_LEN, KV_W), cache_k.dtype),
            jax.ShapeDtypeStruct((MAX_BATCH, MAX_SEQ_LEN, KV_W), cache_v.dtype),
        ),
        input_output_aliases={10: 1, 11: 2},                           # in-place KV cache
        compiler_params=pltpu.CompilerParams(
            dimension_semantics=("parallel",)),
    )(x2, prep["attn_norm_w"], prep["ffn_norm_w"], prep["wqkv_ext"],
      prep["wo_t"], prep["w13"], prep["w2_t"], cos_tab, sin_tab, mask2, ck3, cv3)

    return (out2.reshape(B, S, D),
            ck_new.reshape(MAX_BATCH, MAX_SEQ_LEN, N_KV_HEADS, HEAD_DIM),
            cv_new.reshape(MAX_BATCH, MAX_SEQ_LEN, N_KV_HEADS, HEAD_DIM))


transformer_block = jax.jit(_transformer_block_impl,
                            static_argnums=(2,), donate_argnums=(6, 7))


# ------------------------------ pure-JAX reference ---------------------------
def ref_block(params, x, start_pos, cos, sin, mask, cache_k, cache_v):
    B, S, D = x.shape

    def rms(z, w):
        ms = jnp.mean(z * z, axis=-1, keepdims=True)
        return (z * jax.lax.rsqrt(ms + NORM_EPS)) * w

    def rope(z):
        b, s, h, dh = z.shape
        zp = z.reshape(b, s, h, dh // 2, 2)
        ze, zo = zp[..., 0], zp[..., 1]
        c = cos[None, :, None, :]
        sn = sin[None, :, None, :]
        return jnp.stack([ze * c - zo * sn, ze * sn + zo * c], -1).reshape(z.shape)

    xn = rms(x, params["attn_norm_w"])
    xq = (xn @ params["wq"].T).reshape(B, S, N_HEADS, HEAD_DIM)
    xk = (xn @ params["wk"].T).reshape(B, S, N_KV_HEADS, HEAD_DIM)
    xv = (xn @ params["wv"].T).reshape(B, S, N_KV_HEADS, HEAD_DIM)
    xq, xk = rope(xq), rope(xk)
    ck = cache_k.at[:B, start_pos:start_pos + S].set(xk)
    cv = cache_v.at[:B, start_pos:start_pos + S].set(xv)
    L = start_pos + S
    keys = jnp.repeat(ck[:B, :L], N_REP, axis=2)
    values = jnp.repeat(cv[:B, :L], N_REP, axis=2)
    q = jnp.transpose(xq, (0, 2, 1, 3))
    k = jnp.transpose(keys, (0, 2, 1, 3))
    v = jnp.transpose(values, (0, 2, 1, 3))
    scores = jnp.einsum("bhsd,bhld->bhsl", q, k) / math.sqrt(HEAD_DIM)
    scores = scores + mask[None, None]
    p = jax.nn.softmax(scores, axis=-1)
    o = jnp.einsum("bhsl,bhld->bhsd", p, v)
    o = jnp.transpose(o, (0, 2, 1, 3)).reshape(B, S, -1)
    h = x + o @ params["wo"].T
    hn = rms(h, params["ffn_norm_w"])
    a = hn @ params["w1"].T
    b = hn @ params["w3"].T
    ffn = (a * jax.nn.sigmoid(a) * b) @ params["w2"].T
    return h + ffn, ck, cv


# ----------------------------------- main ------------------------------------
if __name__ == "__main__":
    key = jax.random.PRNGKey(0)
    ks = jax.random.split(key, 10)

    def w(k, shape, scale=0.02):
        return (scale * jax.random.normal(k, shape)).astype(jnp.float32)

    params = {
        "wq": w(ks[0], (N_HEADS * HEAD_DIM, DIM)),
        "wk": w(ks[1], (N_KV_HEADS * HEAD_DIM, DIM)),
        "wv": w(ks[2], (N_KV_HEADS * HEAD_DIM, DIM)),
        "wo": w(ks[3], (DIM, N_HEADS * HEAD_DIM)),
        "w1": w(ks[4], (FFN_HIDDEN, DIM)),
        "w2": w(ks[5], (DIM, FFN_HIDDEN)),
        "w3": w(ks[6], (FFN_HIDDEN, DIM)),
        "attn_norm_w": (jnp.ones((DIM,)) + 0.1 * jax.random.normal(ks[7], (DIM,))).astype(jnp.float32),
        "ffn_norm_w": (jnp.ones((DIM,)) + 0.1 * jax.random.normal(ks[8], (DIM,))).astype(jnp.float32),
    }
    prep = prepare_params(params)

    x = jax.random.normal(ks[9], (BATCH, SEQLEN, DIM), dtype=jnp.float32)

    # precompute_freqs_cis (theta=10000), sliced to [start_pos, start_pos+seqlen)
    inv_freq = 1.0 / (10000.0 ** (jnp.arange(0, HEAD_DIM, 2, dtype=jnp.float32) / HEAD_DIM))
    t = jnp.arange(MAX_SEQ_LEN, dtype=jnp.float32)
    angles = jnp.outer(t, inv_freq)[START_POS:START_POS + SEQLEN]   # (S, Dh/2)
    cos, sin = jnp.cos(angles), jnp.sin(angles)

    # causal mask as built in llama: hstack(zeros(S, start_pos), triu(-inf, 1))
    causal = jnp.triu(jnp.full((SEQLEN, SEQLEN), -jnp.inf, dtype=jnp.float32), 1)
    mask = jnp.concatenate(
        [jnp.zeros((SEQLEN, START_POS), dtype=jnp.float32), causal], axis=1)

    cache_k = jnp.zeros((MAX_BATCH, MAX_SEQ_LEN, N_KV_HEADS, HEAD_DIM), jnp.float32)
    cache_v = jnp.zeros((MAX_BATCH, MAX_SEQ_LEN, N_KV_HEADS, HEAD_DIM), jnp.float32)

    # reference first (cache_k/cache_v are donated to the kernel call below)
    ref_out, ref_ck, ref_cv = ref_block(
        params, x, START_POS, cos, sin, mask, cache_k, cache_v)
    ref_out = jax.block_until_ready(ref_out)

    out, new_ck, new_cv = transformer_block(
        prep, x, START_POS, cos, sin, mask, cache_k, cache_v)
    out = jax.block_until_ready(out)

    assert out.shape == (BATCH, SEQLEN, DIM)
    err = float(jnp.max(jnp.abs(out - ref_out)))
    assert jnp.allclose(out, ref_out, atol=TOL, rtol=TOL), err
    assert jnp.allclose(new_ck, ref_ck, atol=TOL, rtol=TOL)
    assert jnp.allclose(new_cv, ref_cv, atol=TOL, rtol=TOL)
    print("KERNEL_OK")
</pallas_src>

<mosaic_0001>
module attributes {stable_mosaic.version = 11 : i64} {
  func.func @_block_kernel(%arg0: i32, %arg1: memref<8x64xf32, #tpu.memory_space<vmem>>, %arg2: memref<1x64xf32, #tpu.memory_space<vmem>>, %arg3: memref<1x64xf32, #tpu.memory_space<vmem>>, %arg4: memref<64x256xbf16, #tpu.memory_space<vmem>>, %arg5: memref<64x64xbf16, #tpu.memory_space<vmem>>, %arg6: memref<64x384xbf16, #tpu.memory_space<vmem>>, %arg7: memref<192x64xbf16, #tpu.memory_space<vmem>>, %arg8: memref<8x128xf32, #tpu.memory_space<vmem>>, %arg9: memref<8x128xf32, #tpu.memory_space<vmem>>, %arg10: memref<16x8xf32, #tpu.memory_space<vmem>>, %arg11: memref<1x8x32xf32, #tpu.memory_space<vmem>>, %arg12: memref<1x8x32xf32, #tpu.memory_space<vmem>>, %arg13: memref<8x64xf32, #tpu.memory_space<vmem>>, %arg14: memref<1x8x32xf32, #tpu.memory_space<vmem>>, %arg15: memref<1x8x32xf32, #tpu.memory_space<vmem>>) attributes {dimension_semantics = [#tpu.dimension_semantics<parallel>], iteration_bounds = array<i64: 2>, scalar_prefetch = 0 : i64, scratch_operands = 0 : i64, tpu.core_type = #tpu.core_type<tc>, window_params = [{transform_indices = @transform_0, window_bounds = array<i64: 8, 64>}, {pipeline_mode = #tpu.pipeline_mode<synchronous>, transform_indices = @transform_1, window_bounds = array<i64: 1, 64>}, {pipeline_mode = #tpu.pipeline_mode<synchronous>, transform_indices = @transform_2, window_bounds = array<i64: 1, 64>}, {pipeline_mode = #tpu.pipeline_mode<synchronous>, transform_indices = @transform_3, window_bounds = array<i64: 64, 256>}, {pipeline_mode = #tpu.pipeline_mode<synchronous>, transform_indices = @transform_4, window_bounds = array<i64: 64, 64>}, {pipeline_mode = #tpu.pipeline_mode<synchronous>, transform_indices = @transform_5, window_bounds = array<i64: 64, 384>}, {pipeline_mode = #tpu.pipeline_mode<synchronous>, transform_indices = @transform_6, window_bounds = array<i64: 192, 64>}, {transform_indices = @transform_7, window_bounds = array<i64: 8, 128>}, {transform_indices = @transform_8, window_bounds = array<i64: 8, 128>}, {pipeline_mode = #tpu.pipeline_mode<synchronous>, transform_indices = @transform_9, window_bounds = array<i64: 16, 8>}, {transform_indices = @transform_10, window_bounds = array<i64: 1, 8, 32>}, {transform_indices = @transform_11, window_bounds = array<i64: 1, 8, 32>}, {transform_indices = @transform_12, window_bounds = array<i64: 8, 64>}, {transform_indices = @transform_13, window_bounds = array<i64: 1, 8, 32>}, {transform_indices = @transform_14, window_bounds = array<i64: 1, 8, 32>}]} {
    %c0 = arith.constant 0 : index
    %c0_0 = arith.constant 0 : index
    %0 = vector.load %arg1[%c0, %c0_0] : memref<8x64xf32, #tpu.memory_space<vmem>>, vector<8x64xf32>
    %1 = arith.mulf %0, %0 : vector<8x64xf32>
    %cst = arith.constant dense<0.000000e+00> : vector<8xf32>
    %2 = vector.multi_reduction <add>, %1, %cst [1] : vector<8x64xf32> to vector<8xf32>
    %3 = vector.shape_cast %2 : vector<8xf32> to vector<8x1xf32>
    %cst_1 = arith.constant 6.400000e+01 : f32
    %4 = vector.broadcast %cst_1 : f32 to vector<8x1xf32>
    %5 = arith.divf %3, %4 : vector<8x1xf32>
    %cst_2 = arith.constant 9.99999974E-6 : f32
    %6 = vector.broadcast %cst_2 : f32 to vector<8x1xf32>
    %7 = arith.addf %5, %6 : vector<8x1xf32>
    %8 = math.rsqrt %7 : vector<8x1xf32>
    %9 = vector.broadcast %8 : vector<8x1xf32> to vector<8x64xf32>
    %10 = arith.mulf %0, %9 : vector<8x64xf32>
    %c0_3 = arith.constant 0 : index
    %c0_4 = arith.constant 0 : index
    %11 = vector.load %arg2[%c0_3, %c0_4] : memref<1x64xf32, #tpu.memory_space<vmem>>, vector<1x64xf32>
    %12 = vector.broadcast %11 : vector<1x64xf32> to vector<8x64xf32>
    %13 = arith.mulf %10, %12 : vector<8x64xf32>
    %14 = arith.truncf %13 : vector<8x64xf32> to vector<8x64xbf16>
    %c0_5 = arith.constant 0 : index
    %c0_6 = arith.constant 0 : index
    %15 = vector.load %arg4[%c0_5, %c0_6] : memref<64x256xbf16, #tpu.memory_space<vmem>>, vector<64x256xbf16>
    %cst_7 = arith.constant dense<0.000000e+00> : vector<8x256xf32>
    %16 = tpu.matmul %14, %15, %cst_7 {dimension_numbers = #tpu.dot_dimension_numbers<[1], [0], [0], [1], [0, 0, 1, 1], [], []>} : vector<8x64xbf16>, vector<64x256xbf16>, vector<8x256xf32> -> vector<8x256xf32>
    %17 = vector.extract_strided_slice %16 {offsets = [0, 0], sizes = [8, 128], strides = [1, 1]} : vector<8x256xf32> to vector<8x128xf32>
    %c0_8 = arith.constant 0 : index
    %c0_9 = arith.constant 0 : index
    %18 = vector.load %arg8[%c0_8, %c0_9] : memref<8x128xf32, #tpu.memory_space<vmem>>, vector<8x128xf32>
    %19 = arith.mulf %17, %18 : vector<8x128xf32>
    %20 = vector.extract_strided_slice %16 {offsets = [0, 128], sizes = [8, 128], strides = [1, 1]} : vector<8x256xf32> to vector<8x128xf32>
    %c0_10 = arith.constant 0 : index
    %c0_11 = arith.constant 0 : index
    %21 = vector.load %arg9[%c0_10, %c0_11] : memref<8x128xf32, #tpu.memory_space<vmem>>, vector<8x128xf32>
    %22 = arith.mulf %20, %21 : vector<8x128xf32>
    %23 = arith.addf %19, %22 : vector<8x128xf32>
    %24 = vector.extract_strided_slice %23 {offsets = [0, 0], sizes = [8, 64], strides = [1, 1]} : vector<8x128xf32> to vector<8x64xf32>
    %25 = arith.truncf %24 : vector<8x64xf32> to vector<8x64xbf16>
    %26 = vector.extract_strided_slice %23 {offsets = [0, 64], sizes = [8, 32], strides = [1, 1]} : vector<8x128xf32> to vector<8x32xf32>
    %27 = vector.extract_strided_slice %23 {offsets = [0, 96], sizes = [8, 32], strides = [1, 1]} : vector<8x128xf32> to vector<8x32xf32>
    %28 = vector.shape_cast %26 : vector<8x32xf32> to vector<1x8x32xf32>
    %c0_12 = arith.constant 0 : index
    %c0_13 = arith.constant 0 : index
    %c0_14 = arith.constant 0 : index
    %29 = vector.load %arg14[%c0_12, %c0_13, %c0_14] : memref<1x8x32xf32, #tpu.memory_space<vmem>>, vector<1x8x32xf32>
    tpu.vector_store %arg14[%c0_12, %c0_13, %c0_14], %28 {strides = array<i32>} : memref<1x8x32xf32, #tpu.memory_space<vmem>>, vector<1x8x32xf32>,
    %30 = vector.shape_cast %27 : vector<8x32xf32> to vector<1x8x32xf32>
    %c0_15 = arith.constant 0 : index
    %c0_16 = arith.constant 0 : index
    %c0_17 = arith.constant 0 : index
    %31 = vector.load %arg15[%c0_15, %c0_16, %c0_17] : memref<1x8x32xf32, #tpu.memory_space<vmem>>, vector<1x8x32xf32>
    tpu.vector_store %arg15[%c0_15, %c0_16, %c0_17], %30 {strides = array<i32>} : memref<1x8x32xf32, #tpu.memory_space<vmem>>, vector<1x8x32xf32>,
    %c0_18 = arith.constant 0 : index
    %c0_19 = arith.constant 0 : index
    %32 = vector.load %arg10[%c0_18, %c0_19] : memref<16x8xf32, #tpu.memory_space<vmem>>, vector<16x8xf32>
    %33 = arith.truncf %26 : vector<8x32xf32> to vector<8x32xbf16>
    %34 = arith.truncf %27 : vector<8x32xf32> to vector<8x32xbf16>
    %35 = vector.extract_strided_slice %33 {offsets = [0, 0], sizes = [8, 16], strides = [1, 1]} : vector<8x32xbf16> to vector<8x16xbf16>
    %36 = vector.extract_strided_slice %34 {offsets = [0, 0], sizes = [8, 16], strides = [1, 1]} : vector<8x32xbf16> to vector<8x16xbf16>
    %37 = vector.extract_strided_slice %25 {offsets = [0, 0], sizes = [8, 16], strides = [1, 1]} : vector<8x64xbf16> to vector<8x16xbf16>
    %38 = vector.extract_strided_slice %25 {offsets = [0, 16], sizes = [8, 16], strides = [1, 1]} : vector<8x64xbf16> to vector<8x16xbf16>
    %39 = tpu.concatenate %37, %38 in 0 : vector<8x16xbf16>, vector<8x16xbf16> -> vector<16x16xbf16>
    %cst_20 = arith.constant dense<0.000000e+00> : vector<16x8xf32>
    %40 = tpu.matmul %39, %35, %cst_20 {dimension_numbers = #tpu.dot_dimension_numbers<[1], [1], [0], [0], [0, 0, 1, 0], [], []>} : vector<16x16xbf16>, vector<8x16xbf16>, vector<16x8xf32> -> vector<16x8xf32>
    %cst_21 = arith.constant 2.500000e-01 : f32
    %41 = vector.broadcast %cst_21 : f32 to vector<16x8xf32>
    %42 = arith.mulf %40, %41 : vector<16x8xf32>
    %43 = arith.addf %42, %32 : vector<16x8xf32>
    %cst_22 = arith.constant dense<0xFF800000> : vector<16xf32>
    %44 = vector.multi_reduction <maximumf>, %43, %cst_22 [1] : vector<16x8xf32> to vector<16xf32>
    %45 = vector.shape_cast %44 : vector<16xf32> to vector<16x1xf32>
    %46 = vector.broadcast %45 : vector<16x1xf32> to vector<16x8xf32>
    %47 = arith.subf %43, %46 : vector<16x8xf32>
    %48 = math.exp %47 : vector<16x8xf32>
    %cst_23 = arith.constant dense<0.000000e+00> : vector<16xf32>
    %49 = vector.multi_reduction <add>, %48, %cst_23 [1] : vector<16x8xf32> to vector<16xf32>
    %50 = vector.shape_cast %49 : vector<16xf32> to vector<16x1xf32>
    %51 = tpu.reciprocal %50 {approx = true} : vector<16x1xf32> -> vector<16x1xf32>
    %52 = vector.broadcast %51 : vector<16x1xf32> to vector<16x8xf32>
    %53 = arith.mulf %48, %52 : vector<16x8xf32>
    %54 = arith.truncf %53 : vector<16x8xf32> to vector<16x8xbf16>
    %cst_24 = arith.constant dense<0.000000e+00> : vector<16x16xf32>
    %55 = tpu.matmul %54, %36, %cst_24 {dimension_numbers = #tpu.dot_dimension_numbers<[1], [0], [0], [1], [0, 0, 1, 1], [], []>} : vector<16x8xbf16>, vector<8x16xbf16>, vector<16x16xf32> -> vector<16x16xf32>
    %56 = vector.extract_strided_slice %55 {offsets = [0, 0], sizes = [8, 16], strides = [1, 1]} : vector<16x16xf32> to vector<8x16xf32>
    %57 = vector.extract_strided_slice %55 {offsets = [8, 0], sizes = [8, 16], strides = [1, 1]} : vector<16x16xf32> to vector<8x16xf32>
    %58 = vector.extract_strided_slice %33 {offsets = [0, 16], sizes = [8, 16], strides = [1, 1]} : vector<8x32xbf16> to vector<8x16xbf16>
    %59 = vector.extract_strided_slice %34 {offsets = [0, 16], sizes = [8, 16], strides = [1, 1]} : vector<8x32xbf16> to vector<8x16xbf16>
    %60 = vector.extract_strided_slice %25 {offsets = [0, 32], sizes = [8, 16], strides = [1, 1]} : vector<8x64xbf16> to vector<8x16xbf16>
    %61 = vector.extract_strided_slice %25 {offsets = [0, 48], sizes = [8, 16], strides = [1, 1]} : vector<8x64xbf16> to vector<8x16xbf16>
    %62 = tpu.concatenate %60, %61 in 0 : vector<8x16xbf16>, vector<8x16xbf16> -> vector<16x16xbf16>
    %cst_25 = arith.constant dense<0.000000e+00> : vector<16x8xf32>
    %63 = tpu.matmul %62, %58, %cst_25 {dimension_numbers = #tpu.dot_dimension_numbers<[1], [1], [0], [0], [0, 0, 1, 0], [], []>} : vector<16x16xbf16>, vector<8x16xbf16>, vector<16x8xf32> -> vector<16x8xf32>
    %cst_26 = arith.constant 2.500000e-01 : f32
    %64 = vector.broadcast %cst_26 : f32 to vector<16x8xf32>
    %65 = arith.mulf %63, %64 : vector<16x8xf32>
    %66 = arith.addf %65, %32 : vector<16x8xf32>
    %cst_27 = arith.constant dense<0xFF800000> : vector<16xf32>
    %67 = vector.multi_reduction <maximumf>, %66, %cst_27 [1] : vector<16x8xf32> to vector<16xf32>
    %68 = vector.shape_cast %67 : vector<16xf32> to vector<16x1xf32>
    %69 = vector.broadcast %68 : vector<16x1xf32> to vector<16x8xf32>
    %70 = arith.subf %66, %69 : vector<16x8xf32>
    %71 = math.exp %70 : vector<16x8xf32>
    %cst_28 = arith.constant dense<0.000000e+00> : vector<16xf32>
    %72 = vector.multi_reduction <add>, %71, %cst_28 [1] : vector<16x8xf32> to vector<16xf32>
    %73 = vector.shape_cast %72 : vector<16xf32> to vector<16x1xf32>
    %74 = tpu.reciprocal %73 {approx = true} : vector<16x1xf32> -> vector<16x1xf32>
    %75 = vector.broadcast %74 : vector<16x1xf32> to vector<16x8xf32>
    %76 = arith.mulf %71, %75 : vector<16x8xf32>
    %77 = arith.truncf %76 : vector<16x8xf32> to vector<16x8xbf16>
    %cst_29 = arith.constant dense<0.000000e+00> : vector<16x16xf32>
    %78 = tpu.matmul %77, %59, %cst_29 {dimension_numbers = #tpu.dot_dimension_numbers<[1], [0], [0], [1], [0, 0, 1, 1], [], []>} : vector<16x8xbf16>, vector<8x16xbf16>, vector<16x16xf32> -> vector<16x16xf32>
    %79 = vector.extract_strided_slice %78 {offsets = [0, 0], sizes = [8, 16], strides = [1, 1]} : vector<16x16xf32> to vector<8x16xf32>
    %80 = vector.extract_strided_slice %78 {offsets = [8, 0], sizes = [8, 16], strides = [1, 1]} : vector<16x16xf32> to vector<8x16xf32>
    %81 = tpu.concatenate %56, %57, %79, %80 in 1 : vector<8x16xf32>, vector<8x16xf32>, vector<8x16xf32>, vector<8x16xf32> -> vector<8x64xf32>
    %82 = arith.truncf %81 : vector<8x64xf32> to vector<8x64xbf16>
    %c0_30 = arith.constant 0 : index
    %c0_31 = arith.constant 0 : index
    %83 = vector.load %arg5[%c0_30, %c0_31] : memref<64x64xbf16, #tpu.memory_space<vmem>>, vector<64x64xbf16>
    %cst_32 = arith.constant dense<0.000000e+00> : vector<8x64xf32>
    %84 = tpu.matmul %82, %83, %cst_32 {dimension_numbers = #tpu.dot_dimension_numbers<[1], [0], [0], [1], [0, 0, 1, 1], [], []>} : vector<8x64xbf16>, vector<64x64xbf16>, vector<8x64xf32> -> vector<8x64xf32>
    %85 = arith.addf %0, %84 : vector<8x64xf32>
    %86 = arith.mulf %85, %85 : vector<8x64xf32>
    %cst_33 = arith.constant dense<0.000000e+00> : vector<8xf32>
    %87 = vector.multi_reduction <add>, %86, %cst_33 [1] : vector<8x64xf32> to vector<8xf32>
    %88 = vector.shape_cast %87 : vector<8xf32> to vector<8x1xf32>
    %cst_34 = arith.constant 6.400000e+01 : f32
    %89 = vector.broadcast %cst_34 : f32 to vector<8x1xf32>
    %90 = arith.divf %88, %89 : vector<8x1xf32>
    %cst_35 = arith.constant 9.99999974E-6 : f32
    %91 = vector.broadcast %cst_35 : f32 to vector<8x1xf32>
    %92 = arith.addf %90, %91 : vector<8x1xf32>
    %93 = math.rsqrt %92 : vector<8x1xf32>
    %94 = vector.broadcast %93 : vector<8x1xf32> to vector<8x64xf32>
    %95 = arith.mulf %85, %94 : vector<8x64xf32>
    %c0_36 = arith.constant 0 : index
    %c0_37 = arith.constant 0 : index
    %96 = vector.load %arg3[%c0_36, %c0_37] : memref<1x64xf32, #tpu.memory_space<vmem>>, vector<1x64xf32>
    %97 = vector.broadcast %96 : vector<1x64xf32> to vector<8x64xf32>
    %98 = arith.mulf %95, %97 : vector<8x64xf32>
    %99 = arith.truncf %98 : vector<8x64xf32> to vector<8x64xbf16>
    %c0_38 = arith.constant 0 : index
    %c0_39 = arith.constant 0 : index
    %100 = vector.load %arg6[%c0_38, %c0_39] : memref<64x384xbf16, #tpu.memory_space<vmem>>, vector<64x384xbf16>
    %cst_40 = arith.constant dense<0.000000e+00> : vector<8x384xf32>
    %101 = tpu.matmul %99, %100, %cst_40 {dimension_numbers = #tpu.dot_dimension_numbers<[1], [0], [0], [1], [0, 0, 1, 1], [], []>} : vector<8x64xbf16>, vector<64x384xbf16>, vector<8x384xf32> -> vector<8x384xf32>
    %102 = vector.extract_strided_slice %101 {offsets = [0, 0], sizes = [8, 192], strides = [1, 1]} : vector<8x384xf32> to vector<8x192xf32>
    %103 = vector.extract_strided_slice %101 {offsets = [0, 192], sizes = [8, 192], strides = [1, 1]} : vector<8x384xf32> to vector<8x192xf32>
    %104 = arith.negf %102 : vector<8x192xf32>
    %105 = math.exp %104 : vector<8x192xf32>
    %cst_41 = arith.constant 1.000000e+00 : f32
    %106 = vector.broadcast %cst_41 : f32 to vector<8x192xf32>
    %107 = arith.addf %106, %105 : vector<8x192xf32>
    %108 = arith.divf %106, %107 : vector<8x192xf32>
    %109 = arith.mulf %102, %108 : vector<8x192xf32>
    %110 = arith.mulf %109, %103 : vector<8x192xf32>
    %111 = arith.truncf %110 : vector<8x192xf32> to vector<8x192xbf16>
    %c0_42 = arith.constant 0 : index
    %c0_43 = arith.constant 0 : index
    %112 = vector.load %arg7[%c0_42, %c0_43] : memref<192x64xbf16, #tpu.memory_space<vmem>>, vector<192x64xbf16>
    %cst_44 = arith.constant dense<0.000000e+00> : vector<8x64xf32>
    %113 = tpu.matmul %111, %112, %cst_44 {dimension_numbers = #tpu.dot_dimension_numbers<[1], [0], [0], [1], [0, 0, 1, 1], [], []>} : vector<8x192xbf16>, vector<192x64xbf16>, vector<8x64xf32> -> vector<8x64xf32>
    %114 = arith.addf %85, %113 : vector<8x64xf32>
    %c0_45 = arith.constant 0 : index
    %c0_46 = arith.constant 0 : index
    %115 = vector.load %arg13[%c0_45, %c0_46] : memref<8x64xf32, #tpu.memory_space<vmem>>, vector<8x64xf32>
    tpu.vector_store %arg13[%c0_45, %c0_46], %114 {strides = array<i32>} : memref<8x64xf32, #tpu.memory_space<vmem>>, vector<8x64xf32>,
    return
  }
  func.func @transform_0(%arg0: i32) -> (i32, i32) {
    %c0_i32 = arith.constant 0 : i32
    %c0_i32_0 = arith.constant 0 : i32
    return %arg0, %c0_i32 : i32, i32
  }
  func.func @transform_1(%arg0: i32) -> (i32, i32) {
    %c0_i32 = arith.constant 0 : i32
    %c0_i32_0 = arith.constant 0 : i32
    %c0_i32_1 = arith.constant 0 : i32
    return %c0_i32, %c0_i32_0 : i32, i32
  }
  func.func @transform_2(%arg0: i32) -> (i32, i32) {
    %c0_i32 = arith.constant 0 : i32
    %c0_i32_0 = arith.constant 0 : i32
    %c0_i32_1 = arith.constant 0 : i32
    return %c0_i32, %c0_i32_0 : i32, i32
  }
  func.func @transform_3(%arg0: i32) -> (i32, i32) {
    %c0_i32 = arith.constant 0 : i32
    %c0_i32_0 = arith.constant 0 : i32
    %c0_i32_1 = arith.constant 0 : i32
    return %c0_i32, %c0_i32_0 : i32, i32
  }
  func.func @transform_4(%arg0: i32) -> (i32, i32) {
    %c0_i32 = arith.constant 0 : i32
    %c0_i32_0 = arith.constant 0 : i32
    %c0_i32_1 = arith.constant 0 : i32
    return %c0_i32, %c0_i32_0 : i32, i32
  }
  func.func @transform_5(%arg0: i32) -> (i32, i32) {
    %c0_i32 = arith.constant 0 : i32
    %c0_i32_0 = arith.constant 0 : i32
    %c0_i32_1 = arith.constant 0 : i32
    return %c0_i32, %c0_i32_0 : i32, i32
  }
  func.func @transform_6(%arg0: i32) -> (i32, i32) {
    %c0_i32 = arith.constant 0 : i32
    %c0_i32_0 = arith.constant 0 : i32
    %c0_i32_1 = arith.constant 0 : i32
    return %c0_i32, %c0_i32_0 : i32, i32
  }
  func.func @transform_7(%arg0: i32) -> (i32, i32) {
    %c0_i32 = arith.constant 0 : i32
    %c0_i32_0 = arith.constant 0 : i32
    return %arg0, %c0_i32 : i32, i32
  }
  func.func @transform_8(%arg0: i32) -> (i32, i32) {
    %c0_i32 = arith.constant 0 : i32
    %c0_i32_0 = arith.constant 0 : i32
    return %arg0, %c0_i32 : i32, i32
  }
  func.func @transform_9(%arg0: i32) -> (i32, i32) {
    %c0_i32 = arith.constant 0 : i32
    %c0_i32_0 = arith.constant 0 : i32
    %c0_i32_1 = arith.constant 0 : i32
    return %c0_i32, %c0_i32_0 : i32, i32
  }
  func.func @transform_10(%arg0: i32) -> (i32, i32, i32) {
    %c0_i32 = arith.constant 0 : i32
    %c0_i32_0 = arith.constant 0 : i32
    %c0_i32_1 = arith.constant 0 : i32
    return %arg0, %c0_i32, %c0_i32_0 : i32, i32, i32
  }
  func.func @transform_11(%arg0: i32) -> (i32, i32, i32) {
    %c0_i32 = arith.constant 0 : i32
    %c0_i32_0 = arith.constant 0 : i32
    %c0_i32_1 = arith.constant 0 : i32
    return %arg0, %c0_i32, %c0_i32_0 : i32, i32, i32
  }
  func.func @transform_12(%arg0: i32) -> (i32, i32) {
    %c0_i32 = arith.constant 0 : i32
    %c0_i32_0 = arith.constant 0 : i32
    return %arg0, %c0_i32 : i32, i32
  }
  func.func @transform_13(%arg0: i32) -> (i32, i32, i32) {
    %c0_i32 = arith.constant 0 : i32
    %c0_i32_0 = arith.constant 0 : i32
    %c0_i32_1 = arith.constant 0 : i32
    return %arg0, %c0_i32, %c0_i32_0 : i32, i32, i32
  }
  func.func @transform_14(%arg0: i32) -> (i32, i32, i32) {
    %c0_i32 = arith.constant 0 : i32
    %c0_i32_0 = arith.constant 0 : i32
    %c0_i32_1 = arith.constant 0 : i32
    return %arg0, %c0_i32, %c0_i32_0 : i32, i32, i32
  }
}

</mosaic_0001>

<bundles_post_ra>
// kernel: tile.25
= control target key start
LH: loop header
LB: loop body
LE: loop exit
PB: predicated region body
PF: predicated region fallthrough
CT: control target
= control target key end

     0   :  { %s22_s0 = inlined_call_operand.vmem [shape: f32[2], index: 0, kind: input, shape index: {}]   ;;  %s23_s1 = inlined_call_operand.vmem [shape: f32[8,2], index: 1, kind: output, shape index: {}]  }
   0x1   :  { %v4_v0 = vld [vmem:[%s22_s0] ss:$0 sm:$0xff] }
   0x2   :  { %5 = vst [vmem:[%s23_s1] sm:$0xff] %v4_v0 }

// kernel: tile.35
= control target key start
LH: loop header
LB: loop body
LE: loop exit
PB: predicated region body
PF: predicated region fallthrough
CT: control target
= control target key end

     0   :  { %vm4_vm0 = vcmask 1047556   ;;  %s73_s14 = smov 80   ;;  %s74_s19 = smov 48   ;;  %vm6_vm1 = vcmask 130048   ;;  %vm16_vm2 = vcmask 786048   ;;  %vm26_vm3 = vcmask 654848   ;;  %s148_s0 = inlined_call_operand.vmem [shape: f32[8,6,16], index: 0, kind: input, shape index: {}]   ;;  %s149_s1 = inlined_call_operand.vmem [shape: f32[8,96], index: 1, kind: output, shape index: {}]  }
   0x1   :  { %v58_v0 = vld [vmem:[%s148_s0 + $0x5] ss:$8 sm:$0xf]   ;;  %v62_v3 = vld [vmem:[%s148_s0 + $0x3] ss:$8 sm:$0xf]  }
   0x2   :  { %v59_v1 = vld [vmem:[%s148_s0 + $0x5] ss:$8 sm:$0xf0]   ;;  %v63_v4 = vld [vmem:[%s148_s0 + $0x3] ss:$8 sm:$0xf0]  }
   0x3   :  { %v13_v2 = vsel %vm4_vm0, %v59_v1, %v58_v0  ;;  %v33_v5 = vsel %vm4_vm0, %v63_v4, %v62_v3  ;;  %v60_v6 = vld [vmem:[%s148_s0 + $0x4] ss:$8 sm:$0xf]   ;;  %v64_v9 = vld [vmem:[%s148_s0 + $0x2] ss:$8 sm:$0xf]  }
   0x4   :  { %14 = vrot.lane.b32.xlu0 %v13_v2, %s73_s14  ;;  %v61_v7 = vld [vmem:[%s148_s0 + $0x4] ss:$8 sm:$0xf0]   ;;  %34 = vrot.lane.b32.xlu1 %v33_v5, %s74_s19  ;;  %v65_v10 = vld [vmem:[%s148_s0 + $0x2] ss:$8 sm:$0xf0]  }
   0x5   :  { %v23_v8 = vsel %vm4_vm0, %v61_v7, %v60_v6  ;;  %v66_v11 = vld [vmem:[%s148_s0 + $0x1] ss:$8 sm:$0xf]   ;;  %v43_v12 = vsel %vm4_vm0, %v65_v10, %v64_v9  ;;  %s75_s28 = smov 64   ;;  %s77_s6 = smov 16   ;;  %vm36_vm4 = vcmask 523648  }
   0x6   :  { %v67_v13 = vld [vmem:[%s148_s0 + $0x1] ss:$8 sm:$0xf0]   ;;  %v2_v14 = vld [vmem:[%s148_s0] ss:$8 sm:$0xf]  }
   0x7   :  { %v3_v15 = vld [vmem:[%s148_s0] ss:$8 sm:$0xf0]   ;;  %s76_s0 = smov 32   ;;  %v53_v16 = vsel %vm4_vm0, %v67_v13, %v66_v11  ;;  %vm46_vm5 = vcmask 392448   ;;  %vm56_vm6 = vcmask 261248  }
   0x8   :  { %24 = vrot.lane.b32.xlu0 %v23_v8, %s75_s28  ;;  %44 = vrot.lane.b32.xlu1 %v43_v12, %s76_s0  ;;  %v5_v17 = vsel %vm4_vm0, %v3_v15, %v2_v14 }
   0x9   :  { %7 = vst.msk [vmem:[%s149_s1] sm:$0xff] %vm6_vm1, %v5_v17  }
   0xc   :  { %54 = vrot.lane.b32.xlu0 %v53_v16, %s77_s6 }
  0x76   :  { %v15_v18 = vpop.permute.xlu0 %14   ;;  %v35_v19 = vpop.permute.xlu1 %34  }
  0x77   :  { %17 = vst.msk [vmem:[%s149_s1] sm:$0xff] %vm16_vm2, %v15_v18  }
  0x7a   :  { %v25_v20 = vpop.permute.xlu0 %24   ;;  %v45_v21 = vpop.permute.xlu1 %44  }
  0x7b   :  { %27 = vst.msk [vmem:[%s149_s1] sm:$0xff] %vm26_vm3, %v25_v20  }
  0x7c   :  { %37 = vst.msk [vmem:[%s149_s1] sm:$0xff] %vm36_vm4, %v35_v19  }
  0x7d   :  { %47 = vst.msk [vmem:[%s149_s1] sm:$0xff] %vm46_vm5, %v45_v21  }
  0x7e   :  { %v55_v22 = vpop.permute.xlu0 %54  }
  0x7f   :  { %57 = vst.msk [vmem:[%s149_s1] sm:$0xff] %vm56_vm6, %v55_v22  }

// kernel: _transformer_block_impl.1
= control target key start
LH: loop header
LB: loop body
LE: loop exit
PB: predicated region body
PF: predicated region fallthrough
CT: control target
= control target key end

     0   :  { %s2330_s0 = inlined_call_operand.vmem [shape: f32[16,64], index: 0, kind: input, shape index: {}]   ;;  %s2331_s1 = inlined_call_operand.vmem [shape: f32[1,64], index: 1, kind: input, shape index: {}]   ;;  %s2332_s2 = inlined_call_operand.vmem [shape: f32[1,64], index: 2, kind: input, shape index: {}]   ;;  %s2333_s3 = inlined_call_operand.vmem [shape: bf16[64,256], index: 3, kind: input, shape index: {}]   ;;  %s2334_s4 = inlined_call_operand.vmem [shape: bf16[64,64], index: 4, kind: input, shape index: {}]   ;;  %s2335_s5 = inlined_call_operand.vmem [shape: bf16[64,384], index: 5, kind: input, shape index: {}]   ;;  %s2336_s6 = inlined_call_operand.vmem [shape: bf16[192,64], index: 6, kind: input, shape index: {}]   ;;  %s2337_s7 = inlined_call_operand.vmem [shape: f32[16,128], index: 7, kind: input, shape index: {}]   ;;  %s2338_s8 = inlined_call_operand.vmem [shape: f32[16,128], index: 8, kind: input, shape index: {}]   ;;  %s2339_s9 = inlined_call_operand.vmem [shape: f32[16,8], index: 9, kind: input, shape index: {}]   ;;  %s2340_s10 = inlined_call_operand.vmem [shape: f32[4,16,32], index: 10, kind: input, shape index: {}, may-alias: {10,13}]   ;;  %s2341_s11 = inlined_call_operand.vmem [shape: f32[4,16,32], index: 11, kind: input, shape index: {}, may-alias: {11,14}]   ;;  %s2342_s12 = inlined_call_operand.hbm [shape: f32[16,64], index: 12, kind: output, shape index: {0}]   ;;  %s2343_s13 = inlined_call_operand.vmem [shape: f32[4,16,32], index: 13, kind: output, shape index: {1}, may-alias: {10,13}]   ;;  %s2344_s14 = inlined_call_operand.vmem [shape: f32[4,16,32], index: 14, kind: output, shape index: {2}, may-alias: {11,14}]  }
   0x1   :  { %2346 = sst [smem:[#allocation6_spill]] %s2330_s0 }
   0x2   :  { %2347 = sst [smem:[#allocation7_spill]] %s2331_s1 }
   0x3   :  { %20 = vsyncpa [#allocation3], 0 }
   0x4   :  { %22 = vsyncpa [#allocation3 + $0x1], 0  ;;  %s1986_s29 = smov 0   ;;  %s1988_s30 = smov 0  }
   0x5   :  { %s1990_s15 = smov 0   ;;  %s1992_s10 = smov 0  }
   0x6 LB: > { %s2007_s11 = sadd.s32 4294967295, %s1899_s10   ;;  %s1584_s16 = sadd.s32 4294967294, %s1899_s10   ;;  %s1899_s10 = sphi %s1992_s10, %s2358_s10   ;;  %s1895_s15 = sphi %s1990_s15, %s2357_s15   ;;  %s1891_s30 = sphi %s1988_s30, %s2356_s30   ;;  %s1887_s29 = sphi %s1986_s29, %s2355_s29  }
   0x7   : > { %s2011_s17 = sadd.s32 1, %s1899_s10   ;;  %s312_s18 = sadd.s32 1, %s1895_s15 }
   0x8   : > { %s309_s19 = ssub.s32 %s1899_s10, %s2011_s17  ;;  %p322_p0 = scmp.ne.s32.totalorder %s1895_s15, %s1891_s30 }
   0x9   : > { %p310_p1 = scmp.eq.s32.totalorder %s309_s19, 0  ;;  %p323_p2 = scmp.eq.s32.totalorder %s2007_s11, 1 }
   0xa   : > { %p328_p3 = scmp.ne.s32.totalorder %s1891_s30, %s1887_s29  ;;  %p329_p4 = scmp.eq.s32.totalorder %s1584_s16, 1 }
   0xb   : > { %s2022_s20 = scalar_select %p310_p1, %s1895_s15, %s312_s18  }
   0xc   : > { %p2024_p5 = por %p323_p2, %p322_p0  ;;  %p2028_p6 = por %p329_p4, %p328_p3 }
   0xd   : > { %2348 = sst [smem:[#allocation5_spill]] %s2022_s20  ;;  %p1587_p7 = scmp.ge.s32.totalorder %s1899_s10, 1 }
   0xe   : > { %p457_p8 = scmp.lt.s32.totalorder %s1899_s10, 3 }
  0x10   : > { %p458_p9 = pnand %p1587_p7, %p457_p8 }
  0x11   : > { %p530_p10 = scmp.lt.s32.totalorder (!%p458_p9), %s2007_s11, 1  ;;  %s2351_s0 = sld [smem:[#allocation6_spill]] (!%p458_p9)  ;;  %vm565_vm0 = vcmask (!%p458_p9), 523264   ;;  %v1765_v3 = vld [vmem:[%s2333_s3 + $0x4] ss:$8 sps:$4 sm:$0xff] (!%p458_p9)   ;;  %v1901_v8 = vmov (!%p458_p9), 0  }
  0x12   : > { %461 = sbr.rel (%p458_p9) target bundleno = 2472 (0x9a8), region = 68  ;;  %v1767_v4 = vld [vmem:[%s2333_s3] ss:$8 sps:$4 sm:$0xff] (!%p458_p9)   ;;  %v1768_v5 = vld [vmem:[%s2333_s3 + $0x14] ss:$8 sps:$4 sm:$0xff] (!%p458_p9)   ;;  %634 = vmatprep.subr.bf16.mxu0 (!%p458_p9), %v1765_v3  ;;  %666 = vmatprep.mubr.bf16.mxu0 (!%p458_p9), %v1901_v8  ;;  %s2352_s1 = sld [smem:[#allocation7_spill]] (!%p458_p9) }
  0x13   : > { %635 = vmatpush1.bf16.msra.mxu0 (!%p458_p9), %v1767_v4  ;;  %v1770_v6 = vld [vmem:[%s2333_s3 + $0x10] ss:$8 sps:$4 sm:$0xff] (!%p458_p9)   ;;  %v1771_v7 = vld [vmem:[%s2333_s3 + $0x24] ss:$8 sps:$4 sm:$0xff] (!%p458_p9)   ;;  %v1773_v9 = vld [vmem:[%s2333_s3 + $0x20] ss:$8 sps:$4 sm:$0xff] (!%p458_p9)  }
  0x14   : > { %636 = vmatprep.subr.bf16.mxu0 (!%p458_p9), %v1768_v5  ;;  %v1774_v10 = vld [vmem:[%s2333_s3 + $0x34] ss:$8 sps:$4 sm:$0xff] (!%p458_p9)   ;;  %v1776_v11 = vld [vmem:[%s2333_s3 + $0x30] ss:$8 sps:$4 sm:$0xff] (!%p458_p9)   ;;  %v1902_v20 = vmov (!%p458_p9), 0.0   ;;  %vm1903_vm1 = vmmov (!%p458_p9), 0  }
  0x15   : > { %1669 = vmatprep.subr.bf16.mxu1 (!%p458_p9), %v1902_v20  ;;  %1671 = vmatprep.mubr.msk.bf16.mxu1 (!%p458_p9), %vm1903_vm1, %v1902_v20  ;;  %s1906_s25 = smov (!%p458_p9), 48   ;;  %vm703_vm2 = vcmask (!%p458_p9), 130048   ;;  %vm697_vm3 = vcmask (!%p458_p9), 1043456   ;;  %v691_v40 = vld [vmem:[%s2339_s9] sm:$0xff] (!%p458_p9)  ;;  %vm754_vm4 = vcmask (!%p458_p9), 64512   ;;  %v692_v44 = vld [vmem:[%s2339_s9 + $0x8] sm:$0xff] (!%p458_p9) }
  0x16   : > { %s2345_s16 = smov (!%p458_p9), 32   ;;  %s1909_s18 = smov (!%p458_p9), 16   ;;  %vm685_vm5 = vcmask (!%p458_p9), 261120   ;;  %vm969_vm6 = vcmask (!%p458_p9), 392192  }
  0x17   : > { %637 = vmatpush1.bf16.msra.mxu0 (!%p458_p9), %v1770_v6  ;;  %p552_p11 = scmp.lt.s32.totalorder (!%p458_p9), %s2007_s11, 3  ;;  %s1910_s26 = smov (!%p458_p9), [#allocation2]  }
  0x18   : > { %638 = vmatprep.subr.bf16.mxu0 (!%p458_p9), %v1771_v7  ;;  %v1596_v16 = vld [vmem:[%s2352_s1] ss:$0 sm:$0xff] (!%p458_p9) }
  0x19   : > { %s531_s23 = scalar_select %p530_p10, %s2007_s11, 1 }
  0x1b   : > { %s2036_s24 = sshll.u32 %s531_s23, 3  ;;  %639 = vmatpush1.bf16.msra.mxu0 %v1773_v9  ;;  %s1905_s23 = smov 112  }
  0x1c   : > { %s533_s27 = scalar_lea.vmem %s2351_s0, %s2036_s24  ;;  %640 = vmatprep.subr.bf16.mxu0 %v1774_v10  ;;  %s537_s28 = scalar_lea.vmem %s2337_s7, %s2036_s24 }
  0x1d   : > { %v2042_v0 = vld [vmem:[%s533_s27] sm:$0xff]  ;;  %s541_s19 = scalar_lea.vmem %s2338_s8, %s2036_s24  ;;  %s1904_s24 = smov 64  }
  0x1e   : > { %v564_v1 = vmul.f32 %v2042_v0, %v2042_v0  ;;  %v675_v21 = vld [vmem:[%s537_s28] sm:$0xff]  ;;  %s1907_s0 = smov 96   ;;  %s513_s28 = sand.u32 1, %s1891_s30  }
  0x1f   : > { %641 = vmatpush1.bf16.msra.mxu0 %v1776_v11  ;;  %v677_v22 = vld [vmem:[%s541_s19] sm:$0xff]  ;;  %s1588_s19 = sshll.u32 %s513_s28, 3 }
  0x20   : > { %v566_v2 = vsel %vm565_vm0, %v564_v1, 0.0  ;;  %1681 = vmatprep.subr.bf16.mxu0 %v1902_v20 }
  0x21   : > { %567 = vadd.xlane.f32.xlu0 %v566_v2 }
  0xae   : > { %v568_v12 = vpop.xlane.xlu0 %567 }
  0xaf   : > { %v570_v13 = vmul.f32 0.015625, %v568_v12 }
  0xb1   : > { %v571_v14 = vadd.f32 1e-05, %v570_v13 }
  0xb3   : > { %1809 = vrsqrt.f32 %v571_v14 }
  0xbd   : > { %v1810_v15 = vpop.eup %1809 }
  0xbe   : > { %v573_v17 = vmul.f32 %v1810_v15, %v2042_v0 }
  0xc0   : > { %v581_v18 = vmul.f32 %v1596_v16, %v573_v17 }
  0xc2   : > { %v582_v19 = vpack.c.bf16 %v581_v18, %v581_v18 }
  0xc4   : > { %1605 = vmatmul.mubr.msk.bf16.vlgmr.msra.gmra.mrb[0].mxu0 %vm565_vm0, %v582_v19 }
  0xc5   : > { %1683 = vmatprep.mubr.msk.bf16.mxu0 %vm1903_vm1, %v1902_v20 }
 0x197   : > { %v668_v23 = vpop.f32.mrb[0].mxu0 }
 0x198   : > { %v676_v24 = vmul.f32 %v675_v21, %v668_v23  ;;  %v670_v25 = vpop.f32.mrb[1].mxu0 }
 0x199   : > { %v678_v26 = vmul.f32 %v677_v22, %v670_v25  ;;  %v672_v27 = vpop.f32.mrb[2].mxu0 }
 0x19a   : > { %v673_v28 = vpop.f32.mrb[3].mxu0 }
 0x19b   : > { %v2091_v29 = vadd.f32 %v678_v26, %v676_v24 }
 0x19d   : > { %v2095_v30 = vpack.c.bf16 %v2091_v29, %v2091_v29 }
 0x19f   : > { %701 = vrot.lane.b32.xlu1 %v2095_v30, %s1904_s24  ;;  %v694_v31 = vrot.slane %v2095_v30, 4 }
 0x1a1   : > { %695 = vrot.lane.b32.xlu0 %v694_v31, %s1905_s23 }
 0x1a3   : > { %830 = vrot.lane.b32.xlu1 %v2095_v30, %s1906_s25 }
 0x211   : > { %v702_v32 = vpop.permute.xlu1 %701 }
 0x212   : > { %v707_v33 = vsel %vm703_vm2, %v702_v32, 0 }
 0x213   : > { %1670 = vmatpush3.bf16.xpose.msra.mxu1 %v707_v33  ;;  %v696_v34 = vpop.permute.xlu0 %695 }
 0x214   : > { %v700_v35 = vsel %vm697_vm3, %v2095_v30, %v696_v34  ;;  %1675 = vmatprep.subr.bf16.mxu1 %v1902_v20 }
 0x215   : > { %v831_v36 = vpop.permute.xlu1 %830  ;;  %828 = vrot.lane.b32.xlu1 %v700_v35, %s1907_s0 }
 0x216   : > { %v836_v37 = vsel %vm703_vm2, %v831_v36, 0 }
 0x217   : > { %1682 = vmatpush3.bf16.xpose.msra.mxu0 %v836_v37 }
 0x218   : > { %1693 = vmatprep.subr.bf16.mxu0 %v1902_v20 }
 0x21a   : > { %1672 = vmatmul.mubr.msk.bf16.vlgmr.msra.gmra.mrb[0].mxu1 %vm703_vm2, %v700_v35 }
 0x21b   : > { %1677 = vmatprep.mubr.msk.bf16.mxu1 %vm1903_vm1, %v1902_v20 }
 0x287   : > { %v829_v38 = vpop.permute.xlu1 %828 }
 0x288   : > { %1684 = vmatmul.mubr.msk.bf16.vlgmr.msra.gmra.mrb[4].mxu0 %vm703_vm2, %v829_v38 }
 0x289   : > { %1701 = vmatprep.mubr.msk.bf16.mxu0 %vm1903_vm1, %v1902_v20 }
 0x2ed   : > { %v743_v39 = vpop.f32.mrb[0].mxu1 }
 0x2ee   : > { %v750_v41 = vmul.f32 0.25, %v743_v39  ;;  %v1673_v42 = vpop.f32.mrb[1].mxu1  ;;  %v1777_v39 = vld [vmem:[%s2334_s4] sm:$0xff]  }
 0x2ef   : > { %v746_v43 = vpop.f32.mrb[2].mxu1  ;;  %1694 = vmatpush3.bf16.msra.mxu0 %v1777_v39  ;;  %v1780_v42 = vld [vmem:[%s2334_s4 + $0x18] sm:$0xff]  }
 0x2f0   : > { %v751_v45 = vmul.f32 0.25, %v746_v43  ;;  %v1674_v46 = vpop.f32.mrb[3].mxu1  ;;  %v752_v47 = vadd.f32 %v750_v41, %v691_v40  ;;  %1695 = vmatprep.subr.bf16.mxu0 %v1902_v20  ;;  %v1779_v41 = vld [vmem:[%s2334_s4 + $0x10] sm:$0xff]  }
 0x2f2   : > { %v755_v48 = vsel %vm754_vm4, %v752_v47, -inf  ;;  %v753_v49 = vadd.f32 %v751_v45, %v692_v44 }
 0x2f3   : > { %756 = vmax.xlane.f32.xlu1 %v755_v48 }
 0x2f4   : > { %v758_v50 = vsel %vm754_vm4, %v753_v49, -inf }
 0x2f5   : > { %759 = vmax.xlane.f32.xlu0 %v758_v50 }
 0x35b   : > { %v872_v51 = vpop.f32.mrb[4].mxu0 }
 0x35c   : > { %v879_v52 = vmul.f32 0.25, %v872_v51  ;;  %v1685_v53 = vpop.f32.mrb[5].mxu0 }
 0x35d   : > { %v875_v54 = vpop.f32.mrb[6].mxu0 }
 0x35e   : > { %v880_v55 = vmul.f32 0.25, %v875_v54  ;;  %v1686_v56 = vpop.f32.mrb[7].mxu0  ;;  %v881_v57 = vadd.f32 %v879_v52, %v691_v40  ;;  %v1778_v40 = vld [vmem:[%s2334_s4 + $0x8] sm:$0xff]  }
 0x35f   : > { %1696 = vmatpush3.bf16.msra.mxu0 %v1778_v40 }
 0x360   : > { %v883_v58 = vsel %vm754_vm4, %v881_v57, -inf  ;;  %v882_v59 = vadd.f32 %v880_v55, %v692_v44  ;;  %1697 = vmatprep.subr.bf16.mxu0 %v1902_v20 }
 0x361   : > { %884 = vmax.xlane.f32.xlu1 %v883_v58 }
 0x362   : > { %v886_v60 = vsel %vm754_vm4, %v882_v59, -inf }
 0x363   : > { %1698 = vmatpush3.bf16.msra.mxu0 %v1779_v41 }
 0x364   : > { %1699 = vmatprep.subr.bf16.mxu0 %v1902_v20 }
 0x365   : > { %887 = vmax.xlane.f32.xlu1 %v886_v60 }
 0x367   : > { %1700 = vmatpush3.bf16.msra.mxu0 %v1780_v42 }
 0x380   : > { %v757_v61 = vpop.xlane.xlu1 %756 }
 0x381   : > { %v761_v62 = vsub.f32 %v752_v47, %v757_v61 }
 0x382   : > { %v760_v63 = vpop.xlane.xlu0 %759 }
 0x383   : > { %v763_v1 = vmul.f32 1.442695, %v761_v62  ;;  %v762_v2 = vsub.f32 %v753_v49, %v760_v63 }
 0x385   : > { %1811 = vpow2.f32 %v763_v1  ;;  %v765_v3 = vmul.f32 1.442695, %v762_v2  ;;  %v1783_v2 = vld [vmem:[%s2335_s5 + $0x4] ss:$12 sps:$4 sm:$0xff]  }
 0x386   : > { %1148 = vmatprep.subr.bf16.mxu0 %v1783_v2 }
 0x387   : > { %1813 = vpow2.f32 %v765_v3  ;;  %v1781_v3 = vld [vmem:[%s2335_s5] ss:$12 sps:$4 sm:$0xff]  }
 0x38f   : > { %v1812_v4 = vpop.eup %1811 }
 0x390   : > { %v767_v5 = vsel %vm754_vm4, %v1812_v4, 0.0 }
 0x391   : > { %v1814_v6 = vpop.eup %1813  ;;  %768 = vadd.xlane.f32.xlu1 %v767_v5  ;;  %v1789_v5 = vld [vmem:[%s2335_s5 + $0x34] ss:$12 sps:$4 sm:$0xff]  }
 0x392   : > { %v770_v7 = vsel %vm754_vm4, %v1814_v6, 0.0 }
 0x393   : > { %771 = vadd.xlane.f32.xlu0 %v770_v7  ;;  %v1792_v7 = vld [vmem:[%s2335_s5 + $0x4c] ss:$12 sps:$4 sm:$0xff]  }
 0x3ee   : > { %v885_v9 = vpop.xlane.xlu1 %884 }
 0x3ef   : > { %v889_v10 = vsub.f32 %v881_v57, %v885_v9  ;;  %v1790_v9 = vld [vmem:[%s2335_s5 + $0x48] ss:$12 sps:$4 sm:$0xff]  }
 0x3f1   : > { %v891_v11 = vmul.f32 1.442695, %v889_v10 }
 0x3f2   : > { %v888_v12 = vpop.xlane.xlu1 %887 }
 0x3f3   : > { %1815 = vpow2.f32 %v891_v11  ;;  %v890_v13 = vsub.f32 %v882_v59, %v888_v12 }
 0x3f5   : > { %v893_v14 = vmul.f32 1.442695, %v890_v13 }
 0x3f7   : > { %1817 = vpow2.f32 %v893_v14  ;;  %v1615_v14 = vld [vmem:[%s2332_s2] ss:$0 sm:$0xff] }
 0x3fd   : > { %v1816_v15 = vpop.eup %1815 }
 0x3fe   : > { %v895_v16 = vsel %vm754_vm4, %v1816_v15, 0.0 }
 0x3ff   : > { %896 = vadd.xlane.f32.xlu1 %v895_v16 }
 0x401   : > { %v1818_v17 = vpop.eup %1817 }
 0x402   : > { %v898_v18 = vsel %vm754_vm4, %v1818_v17, 0.0 }
 0x403   : > { %899 = vadd.xlane.f32.xlu0 %v898_v18 }
 0x410   : > { %778 = vrot.lane.b32.xlu1 %v2095_v30, %s2345_s16 }
 0x419   : > { %906 = vrot.lane.b32.xlu0 %v2095_v30, %s1909_s18 }
 0x41e   : > { %v769_v21 = vpop.xlane.xlu1 %768 }
 0x420   : > { %v772_v19 = vpop.xlane.xlu0 %771 }
 0x421   : > { %1819 = vrcp.f32 %v772_v19  ;;  %v1794_v19 = vld [vmem:[%s2335_s5 + $0x20] ss:$12 sps:$4 sm:$0xff]  }
 0x422   : > { %1821 = vrcp.f32 %v769_v21  ;;  %v1795_v21 = vld [vmem:[%s2335_s5 + $0x38] ss:$12 sps:$4 sm:$0xff]  }
 0x42b   : > { %v1820_v22 = vpop.eup %1819 }
 0x42c   : > { %v1822_v24 = vpop.eup %1821  ;;  %v776_v25 = vmul.f32 %v1820_v22, %v1814_v6  ;;  %v1787_v6 = vld [vmem:[%s2335_s5 + $0x30] ss:$12 sps:$4 sm:$0xff]  }
 0x42d   : > { %v775_v28 = vmul.f32 %v1822_v24, %v1812_v4  ;;  %v1784_v4 = vld [vmem:[%s2335_s5 + $0x18] ss:$12 sps:$4 sm:$0xff]   ;;  %v1796_v22 = vld [vmem:[%s2335_s5 + $0x50] ss:$12 sps:$4 sm:$0xff]   ;;  %v1798_v24 = vld [vmem:[%s2336_s6 + $0x8] sm:$0xff]  }
 0x42f   : > { %v777_v32 = vpack.c.bf16 %v776_v25, %v775_v28  ;;  %v1799_v25 = vld [vmem:[%s2336_s6 + $0x10] sm:$0xff]  }
 0x430   : > { %v1803_v28 = vld [vmem:[%s2336_s6 + $0x30] sm:$0xff]  }
 0x48c   : > { %v897_v23 = vpop.xlane.xlu1 %896 }
 0x48d   : > { %1823 = vrcp.f32 %v897_v23  ;;  %v1797_v23 = vld [vmem:[%s2336_s6] sm:$0xff]  }
 0x490   : > { %v900_v26 = vpop.xlane.xlu0 %899  ;;  %v779_v27 = vpop.permute.xlu1 %778 }
 0x491   : > { %1825 = vrcp.f32 %v900_v26  ;;  %v784_v31 = vsel %vm697_vm3, %v779_v27, 0  ;;  %v1801_v26 = vld [vmem:[%s2336_s6 + $0x20] sm:$0xff]   ;;  %v1802_v27 = vld [vmem:[%s2336_s6 + $0x28] sm:$0xff]  }
 0x492   : > { %1676 = vmatpush3.bf16.msra.mxu1 %v784_v31  ;;  %v1804_v31 = vld [vmem:[%s2336_s6 + $0x38] sm:$0xff]  }
 0x493   : > { %1687 = vmatprep.subr.bf16.mxu1 %v1902_v20 }
 0x494   : > { %v907_v30 = vpop.permute.xlu0 %906 }
 0x495   : > { %v912_v33 = vsel %vm697_vm3, %v907_v30, 0  ;;  %1678 = vmatmul.mubr.msk.bf16.vlgmr.msra.gmra.mrb[4].mxu1 %vm754_vm4, %v777_v32  ;;  %v1805_v32 = vld [vmem:[%s2336_s6 + $0x40] sm:$0xff]   ;;  %v1806_v30 = vld [vmem:[%s2336_s6 + $0x48] sm:$0xff]  }
 0x496   : > { %1688 = vmatpush3.bf16.msra.mxu1 %v912_v33  ;;  %1689 = vmatprep.mubr.msk.bf16.mxu1 %vm1903_vm1, %v1902_v20  ;;  %v1807_v33 = vld [vmem:[%s2336_s6 + $0x50] sm:$0xff]  }
 0x497   : > { %1355 = vmatprep.subr.bf16.mxu1 %v1901_v8  ;;  %v1824_v34 = vpop.eup %1823 }
 0x498   : > { %v903_v36 = vmul.f32 %v1824_v34, %v1816_v15 }
 0x49b   : > { %v1826_v35 = vpop.eup %1825 }
 0x49c   : > { %v904_v37 = vmul.f32 %v1826_v35, %v1818_v17  ;;  %v1793_v17 = vld [vmem:[%s2335_s5 + $0x8] ss:$12 sps:$4 sm:$0xff]  }
 0x49e   : > { %v905_v38 = vpack.c.bf16 %v904_v37, %v903_v36 }
 0x4a0   : > { %1690 = vmatmul.mubr.msk.bf16.vlgmr.msra.gmra.mrb[8].mxu1 %vm754_vm4, %v905_v38  ;;  %v1808_v38 = vld [vmem:[%s2336_s6 + $0x58] sm:$0xff]  }
 0x4a1   : > { %1356 = vmatpush1.bf16.msra.mxu1 %v1797_v23 }
 0x4a2   : > { %1357 = vmatprep.subr.bf16.mxu1 %v1901_v8 }
 0x4a5   : > { %1358 = vmatpush1.bf16.msra.mxu1 %v1798_v24 }
 0x4a6   : > { %1359 = vmatprep.subr.bf16.mxu1 %v1901_v8 }
 0x4a9   : > { %1360 = vmatpush1.bf16.msra.mxu1 %v1799_v25 }
 0x4aa   : > { %1361 = vmatprep.subr.bf16.mxu1 %v1901_v8 }
 0x568   : > { %v820_v43 = vpop.f32.mrb[4].mxu1 }
 0x569   : > { %v1679_v44 = vpop.f32.mrb[5].mxu1 }
 0x56a   : > { %v823_v45 = vpop.f32.mrb[6].mxu1 }
 0x56b   : > { %956 = vrot.lane.b32.xlu1 %v823_v45, %s1909_s18  ;;  %v1680_v46 = vpop.f32.mrb[7].mxu1  ;;  %s553_s18 = scalar_select %p552_p11, %s2007_s11, 3 }
 0x573   : > { %v948_v47 = vpop.f32.mrb[8].mxu1 }
 0x574   : > { %960 = vrot.lane.b32.xlu1 %v948_v47, %s2345_s16  ;;  %v1691_v48 = vpop.f32.mrb[9].mxu1  ;;  %s1841_s16 = sshll.u32 %s1910_s26, 4  ;;  %s1842_s16 = int_to_ptr.vmem [resolvable:$false] %s1841_s16 }
 0x575   : > { %v951_v49 = vpop.f32.mrb[10].mxu1 }
 0x576   : > { %964 = vrot.lane.b32.xlu0 %v951_v49, %s1906_s25  ;;  %v1692_v50 = vpop.f32.mrb[11].mxu1  ;;  %s2353_s25 = smov 32  }
 0x5dd   : > { %v957_v51 = vpop.permute.xlu1 %956 }
 0x5de   : > { %v967_v52 = vsel %vm703_vm2, %v820_v43, %v957_v51 }
 0x5e6   : > { %v961_v53 = vpop.permute.xlu1 %960 }
 0x5e7   : > { %v968_v54 = vsel %vm685_vm5, %v967_v52, %v961_v53 }
 0x5e8   : > { %v965_v55 = vpop.permute.xlu0 %964 }
 0x5e9   : > { %v970_v56 = vsel %vm969_vm6, %v968_v54, %v965_v55 }
 0x5ea   : > { %v971_v57 = vpack.c.bf16 %v970_v56, %v970_v56 }
 0x5ec   : > { %1702 = vmatmul.mubr.msk.bf16.vlgmr.msra.gmra.mrb[8].mxu0 %vm565_vm0, %v971_v57 }
 0x5ed   : > { %1180 = vmatprep.mubr.bf16.mxu0 %v1901_v8  ;;  %1149 = vmatpush1.bf16.msra.mxu0 %v1781_v3 }
 0x6bf   : > { %v1041_v58 = vpop.f32.mrb[8].mxu0 }
 0x6c0   : > { %v2163_v59 = vadd.f32 %v1041_v58, %v2042_v0  ;;  %v1703_v60 = vpop.f32.mrb[9].mxu0  ;;  %v1786_v0 = vld [vmem:[%s2335_s5 + $0x1c] ss:$12 sps:$4 sm:$0xff]  }
 0x6c1   : > { %v1044_v61 = vpop.f32.mrb[10].mxu0  ;;  %1150 = vmatprep.subr.bf16.mxu0 %v1786_v0 }
 0x6c2   : > { %v1704_v62 = vpop.f32.mrb[11].mxu0  ;;  %v1048_v63 = vmul.f32 %v2163_v59, %v2163_v59  ;;  %1151 = vmatpush1.bf16.msra.mxu0 %v1784_v4 }
 0x6c3   : > { %1152 = vmatprep.subr.bf16.mxu0 %v1789_v5 }
 0x6c4   : > { %v1049_v1 = vsel %vm565_vm0, %v1048_v63, 0.0 }
 0x6c5   : > { %1050 = vadd.xlane.f32.xlu1 %v1049_v1 }
 0x6c6   : > { %1153 = vmatpush1.bf16.msra.mxu0 %v1787_v6 }
 0x6c7   : > { %1154 = vmatprep.subr.bf16.mxu0 %v1792_v7 }
 0x6ca   : > { %1155 = vmatpush1.bf16.msra.mxu0 %v1790_v9 }
 0x6cb   : > { %1705 = vmatprep.subr.bf16.mxu0 %v1902_v20 }
 0x752   : > { %v1051_v10 = vpop.xlane.xlu1 %1050 }
 0x753   : > { %v1052_v11 = vmul.f32 0.015625, %v1051_v10 }
 0x755   : > { %v1053_v12 = vadd.f32 1e-05, %v1052_v11 }
 0x757   : > { %1827 = vrsqrt.f32 %v1053_v12 }
 0x761   : > { %v1828_v13 = vpop.eup %1827 }
 0x762   : > { %v1055_v15 = vmul.f32 %v1828_v13, %v2163_v59 }
 0x764   : > { %v1063_v16 = vmul.f32 %v1615_v14, %v1055_v15 }
 0x766   : > { %v1064_v18 = vpack.c.bf16 %v1063_v16, %v1063_v16 }
 0x768   : > { %1628 = vmatmul.mubr.msk.bf16.vlgmr.msra.gmra.mrb[12].mxu0 %vm565_vm0, %v1064_v18 }
 0x769   : > { %1706 = vmatpush3.bf16.msra.mxu0 %v1793_v17  ;;  %1713 = vmatprep.mubr.msk.bf16.mxu0 %vm1903_vm1, %v1902_v20 }
 0x76a   : > { %1707 = vmatprep.subr.bf16.mxu0 %v1902_v20 }
 0x76d   : > { %1708 = vmatpush3.bf16.msra.mxu0 %v1794_v19 }
 0x76e   : > { %1709 = vmatprep.subr.bf16.mxu0 %v1902_v20 }
 0x771   : > { %1710 = vmatpush3.bf16.msra.mxu0 %v1795_v21 }
 0x772   : > { %1711 = vmatprep.subr.bf16.mxu0 %v1902_v20  ;;  %v1800_v20 = vld [vmem:[%s2336_s6 + $0x18] sm:$0xff]  }
 0x773   : > { %1362 = vmatpush1.bf16.msra.mxu1 %v1800_v20 }
 0x774   : > { %1363 = vmatprep.subr.bf16.mxu1 %v1901_v8 }
 0x775   : > { %1712 = vmatpush3.bf16.msra.mxu0 %v1796_v22 }
 0x777   : > { %1364 = vmatpush1.bf16.msra.mxu1 %v1801_v26 }
 0x778   : > { %1714 = vmatmul.mubr.msk.bf16.vlgmr.msra.gmra.mrb[16].mxu0 %vm565_vm0, %v1064_v18  ;;  %1365 = vmatprep.subr.bf16.mxu1 %v1901_v8 }
 0x77b   : > { %1366 = vmatpush1.bf16.msra.mxu1 %v1802_v27 }
 0x77c   : > { %1367 = vmatprep.subr.bf16.mxu1 %v1901_v8 }
 0x77f   : > { %1368 = vmatpush1.bf16.msra.mxu1 %v1803_v28 }
 0x780   : > { %1369 = vmatprep.subr.bf16.mxu1 %v1901_v8 }
 0x783   : > { %1370 = vmatpush1.bf16.msra.mxu1 %v1804_v31 }
 0x784   : > { %1371 = vmatprep.subr.bf16.mxu1 %v1901_v8 }
 0x787   : > { %1372 = vmatpush1.bf16.msra.mxu1 %v1805_v32 }
 0x788   : > { %1373 = vmatprep.subr.bf16.mxu1 %v1901_v8 }
 0x78b   : > { %1374 = vmatpush1.bf16.msra.mxu1 %v1806_v30 }
 0x78c   : > { %1375 = vmatprep.subr.bf16.mxu1 %v1901_v8 }
 0x78f   : > { %1376 = vmatpush1.bf16.msra.mxu1 %v1807_v33 }
 0x790   : > { %1377 = vmatprep.subr.bf16.mxu1 %v1901_v8 }
 0x793   : > { %1378 = vmatpush1.bf16.msra.mxu1 %v1808_v38 }
 0x83b   : > { %v1182_v34 = vpop.f32.mrb[12].mxu0 }
 0x83c   : > { %v1184_v35 = vpop.f32.mrb[13].mxu0  ;;  %v1630_v43 = vmul.f32 -1.442695, %v1182_v34 }
 0x83d   : > { %1245 = vrot.lane.b32.xlu0 %v1184_v35, %s1904_s24  ;;  %v1186_v36 = vpop.f32.mrb[14].mxu0  ;;  %v1631_v8 = vmul.f32 -1.442695, %v1184_v35 }
 0x83e   : > { %v1187_v37 = vpop.f32.mrb[15].mxu0 }
 0x83f   : > { %1829 = vpow2.f32 %v1631_v8 }
 0x840   : > { %1831 = vpow2.f32 %v1630_v43 }
 0x849   : > { %v1830_v44 = vpop.eup %1829 }
 0x84a   : > { %v1832_v45 = vpop.eup %1831  ;;  %v1236_v46 = vadd.f32 1.0, %v1830_v44 }
 0x84b   : > { %v1223_v39 = vpop.f32.mrb[16].mxu0  ;;  %v1235_v47 = vadd.f32 1.0, %v1832_v45 }
 0x84c   : > { %1247 = vrot.lane.b32.xlu0 %v1223_v39, %s1904_s24  ;;  %v1715_v40 = vpop.f32.mrb[17].mxu0  ;;  %1833 = vrcp.f32 %v1236_v46 }
 0x84d   : > { %v1226_v41 = vpop.f32.mrb[18].mxu0  ;;  %1835 = vrcp.f32 %v1235_v47 }
 0x84e   : > { %v1716_v42 = vpop.f32.mrb[19].mxu0 }
 0x850   : > { %682 = vrot.lane.b32.xlu0 %v2091_v29, %s1904_s24  ;;  %s1649_s24 = sshll.u32 %s553_s18, 4  ;;  %s515_s18 = scalar_lea.vmem [#allocation2], %s1588_s19 }
 0x851   : > { %s556_s20 = scalar_lea.vmem %s2343_s13, %s1649_s24  ;;  %s561_s27 = scalar_lea.vmem %s2344_s14, %s1649_s24 }
 0x852   : > { %s1421_s23 = sshll.u32 %s515_s18, 4  ;;  %s2289_s23 = int_to_ptr.vmem [resolvable:$true] %s1421_s23 }
 0x853   : > { %s1837_s24 = scalar_lea.vmem %s2289_s23, 128  ;;  %p1844_p1 = scmp.lt.s32.totalorder %s2289_s23, %s1842_s16 }
 0x854   : > { %687 = vrot.lane.b32.xlu0 %v2091_v29, %s2353_s25  ;;  %s1646_s25 = sshll.u32 %s2007_s11, 7  ;;  %s1398_s11 = scalar_lea.sflag [#allocation3], %s513_s28 }
 0x855   : > { %s2287_s1 = scalar_lea.hbm %s2342_s12, %s1646_s25  ;;  %p1838_p12 = scmp.ne.s32.totalorder %s2289_s23, %s1837_s24 }
 0x856   : > { %v1834_v48 = vpop.eup %1833 }
 0x857   : > { %v1836_v50 = vpop.eup %1835  ;;  %v1242_v51 = vmul.f32 %v1834_v48, %v1184_v35  ;;  %p1839_p13 = pnand %p1838_p12, %p2024_p5 }
 0x858   : > { %v1241_v52 = vmul.f32 %v1836_v50, %v1182_v34 }
 0x859   : > { %p1840_p0 = pneg %p1839_p13 }
 0x8af   : > { %v1246_v49 = vpop.permute.xlu0 %1245 }
 0x8be   : > { %v1248_v29 = vpop.permute.xlu0 %1247 }
 0x8bf   : > { %v1249_v53 = vsel %vm565_vm0, %v1246_v49, %v1248_v29  ;;  %v1253_v54 = vmul.f32 %v1248_v29, %v1242_v51 }
 0x8c0   : > { %v1252_v55 = vmul.f32 %v1249_v53, %v1241_v52 }
 0x8c1   : > { %v1255_v56 = vpack.c.bf16 %v1253_v54, %v1253_v54 }
 0x8c2   : > { %v1254_v57 = vpack.c.bf16 %v1252_v55, %v1252_v55  ;;  %v683_v58 = vpop.permute.xlu0 %682 }
 0x8c3   : > { %686 = vst.msk [vmem:[%s556_s20] sm:$0xff] %vm685_vm5, %v683_v58  ;;  %1644 = vmatprep.mubr.msk.bf16.mxu1 %vm565_vm0, %v1255_v56 }
 0x8c4   : > { %1388 = vmatmul.mubr.bf16.vlgmr.msra.gmra.mrb[12].mxu1 %v1254_v57 }
 0x8c6   : > { %v688_v60 = vpop.permute.xlu0 %687 }
 0x8c7   : > { %690 = vst.msk [vmem:[%s561_s27] sm:$0xff] %vm685_vm5, %v688_v60  ;;  %s1843_s27 = scalar_lea.vmem %s1842_s16, 256 }
 0x8c8   : > { %p1845_p2 = scmp.lt.s32.totalorder %s1843_s27, %s1837_s24 }
 0x8ca   : > { %p1846_p3 = por %p1845_p2, %p1844_p1 }
 0x8cc   : > { %p1847_p4 = pnand %p1846_p3, %p1840_p0 }
 0x997   : > { %v1389_v61 = vpop.f32.mrb[12].mxu1 }
 0x998   : > { %v1395_v62 = vadd.f32 %v1389_v61, %v2163_v59  ;;  %v1391_v63 = vpop.f32.mrb[13].mxu1 }
 0x999   : > { %v1392_v1 = vpop.f32.mrb[14].mxu1 }
 0x99a   : > { %v1393_v2 = vpop.f32.mrb[15].mxu1  ;;  %1396 = vst.msk [vmem:[%s515_s18] sm:$0xff] %vm565_vm0, %v1395_v62 }
 0x99b   : > { %1850 = shalt.err (!%p1847_p4)
}
 0x99c   : > { %s1851_s28 = scalar_lea.hbm %s2287_s1, 128  ;;  %s1855_s18 = scalar_lea.hbm %s2342_s12, 256 }
 0x99d   : > { %p1852_p7 = scmp.ne.s32.totalorder %s2287_s1, %s1851_s28  ;;  %p1856_p10 = scmp.lt.u32.totalorder %s2287_s1, %s2342_s12 }
 0x99e   : > { %p1857_p11 = scmp.lt.u32.totalorder %s1855_s18, %s1851_s28  ;;  %p1859_p13 = scmp.lt.u32.totalorder %s1851_s28, %s2287_s1 }
 0x99f   : > { %p1853_p8 = pnand %p1852_p7, %p2024_p5 }
 0x9a0   : > { %p1858_p12 = por %p1857_p11, %p1856_p10 }
 0x9a1   : > { %p1854_p9 = pneg %p1853_p8 }
 0x9a2   : > { %p1860_p0 = por %p1859_p13, %p1858_p12 }
 0x9a4   : > { %p1861_p1 = pnand %p1860_p0, %p1854_p9 }
 0x9a6   : > { %1864 = shalt.err (!%p1861_p1)
}
 0x9a7   : > { %1717 = dma.vmem_to_hbm [thread:$0]  (%p2024_p5), %s2289_s23, 128, %s2287_s1, %s1398_s11  }
 0x9a8 PF: > { %p1723_p2 = scmp.ge.s32.totalorder %s1899_s10, 2  ;;  %s1439_s24 = sand.u32 1, %s1887_s29  }
 0x9a9   : > { %s1440_s26 = scalar_lea.sflag [#allocation3], %s1439_s24 }
 0x9aa   : > { %p1720_p3 = pnand %p1723_p2, %p2028_p6 }
 0x9ac   : > { %1882 = dma.done.wait (!%p1720_p3), %s1440_s26, 128  }
 0x9ad   : > { %1884 = vsyncadd (!%p1720_p3), %s1440_s26, 4294967168  ;;  %s2354_s16 = sld [smem:[#allocation5_spill]]  ;;  %p25_p4 = scmp.ge.s32.totalorder %s2011_s17, 4  }
 0x9ae   : > { %s2355_s29 = smov %s1891_s30  ;;  %s2356_s30 = smov %s1895_s15 }
 0x9af   : > { %s2358_s10 = smov %s2011_s17  ;;  %27 = sbr.rel (!%p25_p4) target bundleno = 6 (0x6), region = 139 }
 0x9b3   : > { %s2357_s15 = smov %s2354_s16 }
 0x9b6   :  { %1461 = vsyncpa [#allocation3], 1 }
 0x9b7   :  { %1463 = vsyncpa [#allocation3 + $0x1], 1 }

</bundles_post_ra>
